<compile_context>
chip_gen: v7x
topology: tpu7x:2x2x1
jax: 0.10.0
libtpu: 0.0.40
codegen_flags: <defaults>
</compile_context>

<pallas_src>
import jax
import jax.numpy as jnp
from jax.experimental import pallas as pl
from jax.experimental.pallas import tpu as pltpu


def _round_up(x, m):
    return ((x + m - 1) // m) * m


def mlp_critic_kernel(x_ref, w1_ref, b1_ref, w2_ref, b2_ref, w3_ref, b3_ref, o_ref):
    # Layer 1: Linear (bf16 MXU inputs, f32 accumulate) + Tanh (f32).
    h1 = jnp.tanh(
        jnp.dot(x_ref[...], w1_ref[...], preferred_element_type=jnp.float32)
        + b1_ref[...]
    )
    # Layer 2: Linear + Tanh.
    h2 = jnp.tanh(
        jnp.dot(h1.astype(w2_ref.dtype), w2_ref[...],
                preferred_element_type=jnp.float32)
        + b2_ref[...]
    )
    # Output layer (out_features == 1): skip the N=1 MXU pass.  Transpose the
    # activations so the batch lives on the lane axis (XLU slot), then a VPU
    # multiply by the w3 column + sublane reduce yields a lane-dense (1, tb) row.
    h2_t = jnp.transpose(h2)                                     # (hidden2, tb)
    logits_t = (jnp.sum(h2_t * w3_ref[...], axis=0, keepdims=True)
                + b3_ref[...])                                   # (1, tb)
    o_ref[...] = jax.nn.sigmoid(logits_t).astype(o_ref.dtype)    # unmasked stores


def mlp_critic_forward(obs, params, *, batch_tile=None):
    """Fused MLP critic forward. obs: [B, obs_dim] float32. Returns [B] float32."""
    w1, b1, w2, b2, w3, b3 = params
    B, obs_dim = obs.shape
    h1_dim = w1.shape[1]
    h2_dim = w2.shape[1]

    # Batch tile: multiple of 256 (covers v5e/v6e/v7x MXU M-granularity, satisfies the
    # (8, 128) block constraint, and keeps the (1, tb) output block lane-dense).
    if batch_tile is None:
        tb = min(1024, _round_up(B, 256))
    else:
        tb = _round_up(max(int(batch_tile), 128), 128)
    num_tiles = pl.cdiv(B, tb)
    b_pad = num_tiles * tb

    # Pad the batch so B need not divide the tile; padded rows are dropped at the end.
    obs_p = obs if b_pad == B else jnp.pad(obs, ((0, b_pad - B), (0, 0)))

    # bf16 matmul inputs: halves HBM bytes of the only streamed tensor (obs) and uses
    # the native bf16 MXU path.  Biases / w3 / activations stay f32 (v5e has no bf16 VPU).
    obs_bf = obs_p.astype(jnp.bfloat16)
    w1_bf = w1.astype(jnp.bfloat16)
    w2_bf = w2.astype(jnp.bfloat16)
    b1_f = b1.astype(jnp.float32)
    b2_f = b2.astype(jnp.float32)
    w3_f = w3.astype(jnp.float32)   # (h2_dim, 1) column, used on the VPU
    b3_f = b3.astype(jnp.float32)   # (1, 1)

    cost = pl.CostEstimate(
        flops=2 * b_pad * (obs_dim * h1_dim + h1_dim * h2_dim + h2_dim),
        transcendentals=b_pad * (h1_dim + h2_dim + 1),
        bytes_accessed=(obs_bf.size * 2
                        + (w1_bf.size + w2_bf.size) * 2
                        + (b1_f.size + b2_f.size + w3_f.size + b3_f.size) * 4
                        + b_pad * 4),
    )

    out = pl.pallas_call(
        mlp_critic_kernel,
        out_shape=jax.ShapeDtypeStruct((1, b_pad), jnp.float32),
        grid_spec=pltpu.PrefetchScalarGridSpec(
            num_scalar_prefetch=0,
            grid=(num_tiles,),
            in_specs=[
                pl.BlockSpec((tb, obs_dim), lambda i: (i, 0)),      # obs tile (streamed)
                pl.BlockSpec((obs_dim, h1_dim), lambda i: (0, 0)),  # W1 (resident)
                pl.BlockSpec((1, h1_dim), lambda i: (0, 0)),        # b1
                pl.BlockSpec((h1_dim, h2_dim), lambda i: (0, 0)),   # W2
                pl.BlockSpec((1, h2_dim), lambda i: (0, 0)),        # b2
                pl.BlockSpec((h2_dim, 1), lambda i: (0, 0)),        # w3 column
                pl.BlockSpec((1, 1), lambda i: (0, 0)),             # b3
            ],
            out_specs=pl.BlockSpec((1, tb), lambda i: (0, i)),      # lane-dense output
        ),
        compiler_params=pltpu.CompilerParams(
            dimension_semantics=("parallel",),
            vmem_limit_bytes=32 * 1024 * 1024,
        ),
        cost_estimate=cost,
    )(obs_bf, w1_bf, b1_f, w2_bf, b2_f, w3_f, b3_f)

    # torch.squeeze(v_net(obs), -1): drop the padding and the leading axis in the wrapper.
    return out[0, :B]


def init_params(key, obs_dim, hidden_sizes):
    """Deterministic init of Linear layers (stored as (in, out) weights + (1, out) biases)."""
    sizes = [obs_dim] + list(hidden_sizes) + [1]
    params = []
    for j in range(len(sizes) - 1):
        key, kw, kb = jax.random.split(key, 3)
        fan_in, fan_out = sizes[j], sizes[j + 1]
        bound = 1.0 / jnp.sqrt(fan_in)
        w = jax.random.uniform(kw, (fan_in, fan_out), jnp.float32, -bound, bound)
        b = jax.random.uniform(kb, (1, fan_out), jnp.float32, -bound, bound)
        params += [w, b]
    return tuple(params)


def reference_forward(obs, params):
    """Pure-JAX f32 reference matching the PyTorch module semantics."""
    w1, b1, w2, b2, w3, b3 = params
    h = jnp.tanh(obs @ w1 + b1)           # Linear + Tanh
    h = jnp.tanh(h @ w2 + b2)             # Linear + Tanh
    v = jax.nn.sigmoid(h @ w3 + b3)       # Linear + Sigmoid (output_activation)
    return jnp.squeeze(v, -1)


if __name__ == "__main__":
    key = jax.random.PRNGKey(0)
    B, obs_dim = 8, 16
    hidden_sizes = (32, 32)

    key, k_obs, k_par = jax.random.split(key, 3)
    obs = jax.random.normal(k_obs, (B, obs_dim), jnp.float32)
    params = init_params(k_par, obs_dim, hidden_sizes)

    out = jax.block_until_ready(mlp_critic_forward(obs, params))
    ref = reference_forward(obs, params)
    assert out.shape == (B,), out.shape
    # bf16 matmul inputs (f32 accumulation) vs f32 reference -> loose tolerance.
    assert jnp.allclose(out, ref, atol=2e-2, rtol=2e-2), (out, ref)

    # Exercise the multi-tile grid and the B % tile != 0 (padded) path.
    B2 = 300
    key, k_obs2 = jax.random.split(key)
    obs2 = jax.random.normal(k_obs2, (B2, obs_dim), jnp.float32)
    out2 = jax.block_until_ready(mlp_critic_forward(obs2, params, batch_tile=128))
    ref2 = reference_forward(obs2, params)
    assert out2.shape == (B2,), out2.shape
    assert jnp.allclose(out2, ref2, atol=2e-2, rtol=2e-2), (out2, ref2)

    print("KERNEL_OK")
</pallas_src>

<mosaic_0001>
module attributes {stable_mosaic.version = 11 : i64} {
  func.func @mlp_critic_kernel(%arg0: i32, %arg1: memref<256x16xbf16, #tpu.memory_space<vmem>>, %arg2: memref<16x32xbf16, #tpu.memory_space<vmem>>, %arg3: memref<1x32xf32, #tpu.memory_space<vmem>>, %arg4: memref<32x32xbf16, #tpu.memory_space<vmem>>, %arg5: memref<1x32xf32, #tpu.memory_space<vmem>>, %arg6: memref<32x1xf32, #tpu.memory_space<vmem>>, %arg7: memref<1x1xf32, #tpu.memory_space<vmem>>, %arg8: memref<1x256xf32, #tpu.memory_space<vmem>>) attributes {dimension_semantics = [#tpu.dimension_semantics<parallel>], iteration_bounds = array<i64: 1>, scalar_prefetch = 0 : i64, scratch_operands = 0 : i64, tpu.core_type = #tpu.core_type<tc>, window_params = [{transform_indices = @transform_0, window_bounds = array<i64: 256, 16>}, {pipeline_mode = #tpu.pipeline_mode<synchronous>, transform_indices = @transform_1, window_bounds = array<i64: 16, 32>}, {pipeline_mode = #tpu.pipeline_mode<synchronous>, transform_indices = @transform_2, window_bounds = array<i64: 1, 32>}, {pipeline_mode = #tpu.pipeline_mode<synchronous>, transform_indices = @transform_3, window_bounds = array<i64: 32, 32>}, {pipeline_mode = #tpu.pipeline_mode<synchronous>, transform_indices = @transform_4, window_bounds = array<i64: 1, 32>}, {pipeline_mode = #tpu.pipeline_mode<synchronous>, transform_indices = @transform_5, window_bounds = array<i64: 32, 1>}, {pipeline_mode = #tpu.pipeline_mode<synchronous>, transform_indices = @transform_6, window_bounds = array<i64: 1, 1>}, {transform_indices = @transform_7, window_bounds = array<i64: 1, 256>}]} {
    %c0 = arith.constant 0 : index
    %c0_0 = arith.constant 0 : index
    %0 = vector.load %arg1[%c0, %c0_0] : memref<256x16xbf16, #tpu.memory_space<vmem>>, vector<256x16xbf16>
    %c0_1 = arith.constant 0 : index
    %c0_2 = arith.constant 0 : index
    %1 = vector.load %arg2[%c0_1, %c0_2] : memref<16x32xbf16, #tpu.memory_space<vmem>>, vector<16x32xbf16>
    %cst = arith.constant dense<0.000000e+00> : vector<256x32xf32>
    %2 = tpu.matmul %0, %1, %cst {dimension_numbers = #tpu.dot_dimension_numbers<[1], [0], [0], [1], [0, 0, 1, 1], [], []>} : vector<256x16xbf16>, vector<16x32xbf16>, vector<256x32xf32> -> vector<256x32xf32>
    %c0_3 = arith.constant 0 : index
    %c0_4 = arith.constant 0 : index
    %3 = vector.load %arg3[%c0_3, %c0_4] : memref<1x32xf32, #tpu.memory_space<vmem>>, vector<1x32xf32>
    %4 = vector.broadcast %3 : vector<1x32xf32> to vector<256x32xf32>
    %5 = arith.addf %2, %4 : vector<256x32xf32>
    %6 = math.tanh %5 : vector<256x32xf32>
    %7 = arith.truncf %6 : vector<256x32xf32> to vector<256x32xbf16>
    %c0_5 = arith.constant 0 : index
    %c0_6 = arith.constant 0 : index
    %8 = vector.load %arg4[%c0_5, %c0_6] : memref<32x32xbf16, #tpu.memory_space<vmem>>, vector<32x32xbf16>
    %cst_7 = arith.constant dense<0.000000e+00> : vector<256x32xf32>
    %9 = tpu.matmul %7, %8, %cst_7 {dimension_numbers = #tpu.dot_dimension_numbers<[1], [0], [0], [1], [0, 0, 1, 1], [], []>} : vector<256x32xbf16>, vector<32x32xbf16>, vector<256x32xf32> -> vector<256x32xf32>
    %c0_8 = arith.constant 0 : index
    %c0_9 = arith.constant 0 : index
    %10 = vector.load %arg5[%c0_8, %c0_9] : memref<1x32xf32, #tpu.memory_space<vmem>>, vector<1x32xf32>
    %11 = vector.broadcast %10 : vector<1x32xf32> to vector<256x32xf32>
    %12 = arith.addf %9, %11 : vector<256x32xf32>
    %13 = math.tanh %12 : vector<256x32xf32>
    %14 = tpu.transpose %13, [1, 0] : vector<256x32xf32> -> vector<32x256xf32>
    %c0_10 = arith.constant 0 : index
    %c0_11 = arith.constant 0 : index
    %15 = vector.load %arg6[%c0_10, %c0_11] : memref<32x1xf32, #tpu.memory_space<vmem>>, vector<32x1xf32>
    %16 = vector.broadcast %15 : vector<32x1xf32> to vector<32x256xf32>
    %17 = arith.mulf %14, %16 : vector<32x256xf32>
    %cst_12 = arith.constant dense<0.000000e+00> : vector<256xf32>
    %18 = vector.multi_reduction <add>, %17, %cst_12 [0] : vector<32x256xf32> to vector<256xf32>
    %19 = vector.shape_cast %18 : vector<256xf32> to vector<1x256xf32>
    %c0_13 = arith.constant 0 : index
    %c0_14 = arith.constant 0 : index
    %20 = vector.load %arg7[%c0_13, %c0_14] : memref<1x1xf32, #tpu.memory_space<vmem>>, vector<1x1xf32>
    %21 = vector.broadcast %20 : vector<1x1xf32> to vector<1x256xf32>
    %22 = arith.addf %19, %21 : vector<1x256xf32>
    %23 = arith.negf %22 : vector<1x256xf32>
    %24 = math.exp %23 : vector<1x256xf32>
    %cst_15 = arith.constant 1.000000e+00 : f32
    %25 = vector.broadcast %cst_15 : f32 to vector<1x256xf32>
    %26 = arith.addf %25, %24 : vector<1x256xf32>
    %27 = arith.divf %25, %26 : vector<1x256xf32>
    %c0_16 = arith.constant 0 : index
    %c0_17 = arith.constant 0 : index
    %28 = vector.load %arg8[%c0_16, %c0_17] : memref<1x256xf32, #tpu.memory_space<vmem>>, vector<1x256xf32>
    tpu.vector_store %arg8[%c0_16, %c0_17], %27 {strides = array<i32>} : memref<1x256xf32, #tpu.memory_space<vmem>>, vector<1x256xf32>,
    return
  }
  func.func @transform_0(%arg0: i32) -> (i32, i32) {
    %c0_i32 = arith.constant 0 : i32
    %c0_i32_0 = arith.constant 0 : i32
    return %arg0, %c0_i32 : i32, i32
  }
  func.func @transform_1(%arg0: i32) -> (i32, i32) {
    %c0_i32 = arith.constant 0 : i32
    %c0_i32_0 = arith.constant 0 : i32
    %c0_i32_1 = arith.constant 0 : i32
    return %c0_i32, %c0_i32_0 : i32, i32
  }
  func.func @transform_2(%arg0: i32) -> (i32, i32) {
    %c0_i32 = arith.constant 0 : i32
    %c0_i32_0 = arith.constant 0 : i32
    %c0_i32_1 = arith.constant 0 : i32
    return %c0_i32, %c0_i32_0 : i32, i32
  }
  func.func @transform_3(%arg0: i32) -> (i32, i32) {
    %c0_i32 = arith.constant 0 : i32
    %c0_i32_0 = arith.constant 0 : i32
    %c0_i32_1 = arith.constant 0 : i32
    return %c0_i32, %c0_i32_0 : i32, i32
  }
  func.func @transform_4(%arg0: i32) -> (i32, i32) {
    %c0_i32 = arith.constant 0 : i32
    %c0_i32_0 = arith.constant 0 : i32
    %c0_i32_1 = arith.constant 0 : i32
    return %c0_i32, %c0_i32_0 : i32, i32
  }
  func.func @transform_5(%arg0: i32) -> (i32, i32) {
    %c0_i32 = arith.constant 0 : i32
    %c0_i32_0 = arith.constant 0 : i32
    %c0_i32_1 = arith.constant 0 : i32
    return %c0_i32, %c0_i32_0 : i32, i32
  }
  func.func @transform_6(%arg0: i32) -> (i32, i32) {
    %c0_i32 = arith.constant 0 : i32
    %c0_i32_0 = arith.constant 0 : i32
    %c0_i32_1 = arith.constant 0 : i32
    return %c0_i32, %c0_i32_0 : i32, i32
  }
  func.func @transform_7(%arg0: i32) -> (i32, i32) {
    %c0_i32 = arith.constant 0 : i32
    %c0_i32_0 = arith.constant 0 : i32
    return %c0_i32, %arg0 : i32, i32
  }
}

</mosaic_0001>

<bundles_post_ra>
// kernel: tpu_custom_call.1
= control target key start
LH: loop header
LB: loop body
LE: loop exit
PB: predicated region body
PF: predicated region fallthrough
CT: control target
= control target key end

     0   :  { %s1438_s0 = inlined_call_operand.vmem [shape: bf16[256,16], index: 0, kind: input, shape index: {}]   ;;  %s1439_s1 = inlined_call_operand.vmem [shape: bf16[16,32], index: 1, kind: input, shape index: {}]   ;;  %s1440_s2 = inlined_call_operand.vmem [shape: f32[1,32], index: 2, kind: input, shape index: {}]   ;;  %s1441_s3 = inlined_call_operand.vmem [shape: bf16[32,32], index: 3, kind: input, shape index: {}]   ;;  %s1442_s4 = inlined_call_operand.vmem [shape: f32[1,32], index: 4, kind: input, shape index: {}]   ;;  %s1443_s5 = inlined_call_operand.vmem [shape: f32[32,1], index: 5, kind: input, shape index: {}]   ;;  %s1444_s6 = inlined_call_operand.<no memory space> [shape: f32[1,1], index: 6, kind: input, shape index: {}]   ;;  %s1445_s7 = inlined_call_operand.hbm [shape: f32[1,256], index: 7, kind: output, shape index: {}]  }
   0x1   :  { %v12_v0 = vstv %s1444_s6 }
   0x2   :  { %13 = vst [vmem:[#allocation2] sm:$0x1] %v12_v0 }
   0x3   :  { %v1020_v1 = vld [vmem:[%s1439_s1] sm:$0xff]   ;;  %vm157_vm0 = vcmask 130048   ;;  %v1022_v3 = vld [vmem:[%s1438_s0 + $0x8] sm:$0xff]   ;;  %v1023_v4 = vld [vmem:[%s1438_s0 + $0x10] sm:$0xff]  }
   0x4   :  { %v1021_v2 = vld [vmem:[%s1438_s0] sm:$0xff]   ;;  %945 = vmatprep.subr.bf16.mxu0 %v1020_v1  ;;  %v1024_v5 = vld [vmem:[%s1438_s0 + $0x18] sm:$0xff]   ;;  %v1026_v7 = vld [vmem:[%s1438_s0 + $0x28] sm:$0xff]  }
   0x5   :  { %946 = vmatpush3.bf16.msra.mxu0 %v1020_v1  ;;  %947 = vmatprep.mubr.msk.bf16.mxu0 %vm157_vm0, %v1021_v2  ;;  %v1025_v6 = vld [vmem:[%s1438_s0 + $0x20] sm:$0xff]  }
   0x8   :  { %948 = vmatmul.mubr.msk.bf16.vlgmr.msra.gmra.mrb[0].mxu0 %vm157_vm0, %v1022_v3 }
   0x9   :  { %951 = vmatprep.mubr.msk.bf16.mxu0 %vm157_vm0, %v1023_v4 }
  0x10   :  { %952 = vmatmul.mubr.msk.bf16.gmra.mrb[4].mxu0 %vm157_vm0, %v1024_v5 }
  0x11   :  { %955 = vmatprep.mubr.msk.bf16.mxu0 %vm157_vm0, %v1025_v6 }
  0x12   :  { %14 = vsyncpa [#allocation4], 0  ;;  %v1027_v8 = vld [vmem:[%s1438_s0 + $0x30] sm:$0xff]   ;;  %v1028_v9 = vld [vmem:[%s1438_s0 + $0x38] sm:$0xff]   ;;  %v1199_v21 = vmov 0   ;;  %vm438_vm1 = vcmask 261120  }
  0x13   :  { %v1029_v10 = vld [vmem:[%s1438_s0 + $0x40] sm:$0xff]   ;;  %v1030_v11 = vld [vmem:[%s1438_s0 + $0x48] sm:$0xff]   ;;  %v1031_v12 = vld [vmem:[%s1438_s0 + $0x50] sm:$0xff]   ;;  %1019 = vset.pattern.permute.xlu1 %v1199_v21  ;;  %1018 = vset.pattern.permute.xlu0 %v1199_v21 }
  0x14   :  { %v1032_v13 = vld [vmem:[%s1438_s0 + $0x58] sm:$0xff]   ;;  %v1033_v14 = vld [vmem:[%s1438_s0 + $0x60] sm:$0xff]   ;;  %v1034_v15 = vld [vmem:[%s1438_s0 + $0x68] sm:$0xff]  }
  0x15   :  { %v1035_v16 = vld [vmem:[%s1438_s0 + $0x70] sm:$0xff]   ;;  %v1036_v17 = vld [vmem:[%s1438_s0 + $0x78] sm:$0xff]   ;;  %v1037_v18 = vld [vmem:[%s1441_s3] sm:$0xff]  }
  0x16   :  { %979 = vmatprep.subr.bf16.mxu1 %v1037_v18  ;;  %v1038_v19 = vld [vmem:[%s1441_s3 + $0x8] sm:$0xff]   ;;  %v746_v20 = vld [vmem:[%s1443_s5 + $0x10] sm:$0xff]  ;;  %v747_v22 = vld [vmem:[%s1443_s5 + $0x18] sm:$0xff] }
  0x17   :  { %980 = vmatpush3.bf16.msra.mxu1 %v1037_v18  ;;  %760 = vperm.xlu1 %1019, %v746_v20   ;;  %v1327_v23 = vld [vmem:[%s1440_s2] ss:$0 sm:$0xff] }
  0x18   :  { %956 = vmatmul.mubr.msk.bf16.gmra.mrb[8].mxu0 %vm157_vm0, %v1026_v7  ;;  %981 = vmatprep.subr.bf16.mxu1 %v1038_v19 }
  0x19   :  { %959 = vmatprep.mubr.msk.bf16.mxu0 %vm157_vm0, %v1027_v8 }
  0x1b   :  { %982 = vmatpush3.bf16.msra.mxu1 %v1038_v19  ;;  %765 = vperm.xlu1 %1019, %v747_v22  }
  0x20   :  { %960 = vmatmul.mubr.msk.bf16.gmra.mrb[12].mxu0 %vm157_vm0, %v1028_v9 }
  0x21   :  { %963 = vmatprep.mubr.msk.bf16.mxu0 %vm157_vm0, %v1029_v10 }
  0x28   :  { %964 = vmatmul.mubr.msk.bf16.gmra.mrb[16].mxu0 %vm157_vm0, %v1030_v11 }
  0x29   :  { %967 = vmatprep.mubr.msk.bf16.mxu0 %vm157_vm0, %v1031_v12 }
  0x30   :  { %968 = vmatmul.mubr.msk.bf16.gmra.mrb[20].mxu0 %vm157_vm0, %v1032_v13 }
  0x31   :  { %971 = vmatprep.mubr.msk.bf16.mxu0 %vm157_vm0, %v1033_v14 }
  0x38   :  { %972 = vmatmul.mubr.msk.bf16.gmra.mrb[24].mxu0 %vm157_vm0, %v1034_v15 }
  0x39   :  { %975 = vmatprep.mubr.msk.bf16.mxu0 %vm157_vm0, %v1035_v16 }
  0x40   :  { %976 = vmatmul.mubr.msk.bf16.gmra.mrb[28].mxu0 %vm157_vm0, %v1036_v17 }
  0xdb   :  { %v949_v24 = vpop.f32.mrb[0].mxu0 }
  0xdc   :  { %v249_v25 = vadd.f32 %v949_v24, %v1327_v23  ;;  %v240_v26 = vpop.f32.mrb[1].mxu0 }
  0xdd   :  { %v241_v27 = vadd.f32 %v1327_v23, %v240_v26  ;;  %v950_v28 = vpop.f32.mrb[2].mxu0 }
  0xde   :  { %1039 = vtanh.f32 %v249_v25  ;;  %v252_v29 = vadd.f32 %v950_v28, %v1327_v23  ;;  %v243_v30 = vpop.f32.mrb[3].mxu0 }
  0xdf   :  { %1041 = vtanh.f32 %v241_v27  ;;  %v244_v31 = vadd.f32 %v1327_v23, %v243_v30 }
  0xe0   :  { %1043 = vtanh.f32 %v252_v29 }
  0xe1   :  { %1045 = vtanh.f32 %v244_v31 }
  0xe3   :  { %v953_v32 = vpop.f32.mrb[4].mxu0 }
  0xe4   :  { %v265_v33 = vadd.f32 %v953_v32, %v1327_v23  ;;  %v256_v34 = vpop.f32.mrb[5].mxu0 }
  0xe5   :  { %v257_v35 = vadd.f32 %v1327_v23, %v256_v34  ;;  %v954_v36 = vpop.f32.mrb[6].mxu0 }
  0xe6   :  { %1047 = vtanh.f32 %v265_v33  ;;  %v268_v37 = vadd.f32 %v954_v36, %v1327_v23  ;;  %v259_v38 = vpop.f32.mrb[7].mxu0 }
  0xe7   :  { %1049 = vtanh.f32 %v257_v35  ;;  %v260_v39 = vadd.f32 %v1327_v23, %v259_v38 }
  0xe8   :  { %v1040_v40 = vpop.eup %1039  ;;  %1051 = vtanh.f32 %v268_v37 }
  0xe9   :  { %v1042_v41 = vpop.eup %1041  ;;  %1053 = vtanh.f32 %v260_v39 }
  0xea   :  { %v1044_v42 = vpop.eup %1043 }
  0xeb   :  { %v1046_v43 = vpop.eup %1045  ;;  %v957_v44 = vpop.f32.mrb[8].mxu0  ;;  %v400_v45 = vpack.c.bf16 %v1044_v42, %v1040_v40 }
  0xec   :  { %v281_v46 = vadd.f32 %v957_v44, %v1327_v23  ;;  %v272_v47 = vpop.f32.mrb[9].mxu0  ;;  %v399_v48 = vpack.c.bf16 %v1046_v43, %v1042_v41 }
  0xed   :  { %v273_v49 = vadd.f32 %v1327_v23, %v272_v47  ;;  %v958_v50 = vpop.f32.mrb[10].mxu0 }
  0xee   :  { %1055 = vtanh.f32 %v281_v46  ;;  %v284_v51 = vadd.f32 %v958_v50, %v1327_v23  ;;  %v275_v52 = vpop.f32.mrb[11].mxu0  ;;  %983 = vmatprep.mubr.msk.bf16.mxu1 %vm438_vm1, %v399_v48 }
  0xef   :  { %1057 = vtanh.f32 %v273_v49  ;;  %v276_v53 = vadd.f32 %v1327_v23, %v275_v52  ;;  %984 = vmatmul.mubr.msk.bf16.vlgmr.msra.gmra.mrb[0].mxu1 %vm438_vm1, %v400_v45 }
  0xf0   :  { %v1048_v54 = vpop.eup %1047  ;;  %1059 = vtanh.f32 %v284_v51 }
  0xf1   :  { %v1050_v55 = vpop.eup %1049  ;;  %1061 = vtanh.f32 %v276_v53 }
  0xf2   :  { %v1052_v56 = vpop.eup %1051 }
  0xf3   :  { %v1054_v57 = vpop.eup %1053  ;;  %v961_v58 = vpop.f32.mrb[12].mxu0  ;;  %v402_v59 = vpack.c.bf16 %v1052_v56, %v1048_v54 }
  0xf4   :  { %v297_v60 = vadd.f32 %v961_v58, %v1327_v23  ;;  %v288_v61 = vpop.f32.mrb[13].mxu0  ;;  %v401_v62 = vpack.c.bf16 %v1054_v57, %v1050_v55 }
  0xf5   :  { %v289_v63 = vadd.f32 %v1327_v23, %v288_v61  ;;  %v962_v0 = vpop.f32.mrb[14].mxu0 }
  0xf6   :  { %1063 = vtanh.f32 %v297_v60  ;;  %v300_v1 = vadd.f32 %v962_v0, %v1327_v23  ;;  %v291_v2 = vpop.f32.mrb[15].mxu0  ;;  %987 = vmatprep.mubr.msk.bf16.mxu1 %vm438_vm1, %v401_v62 }
  0xf7   :  { %1065 = vtanh.f32 %v289_v63  ;;  %v292_v3 = vadd.f32 %v1327_v23, %v291_v2  ;;  %988 = vmatmul.mubr.msk.bf16.gmra.mrb[4].mxu1 %vm438_vm1, %v402_v59 }
  0xf8   :  { %v1056_v4 = vpop.eup %1055  ;;  %1067 = vtanh.f32 %v300_v1 }
  0xf9   :  { %v1058_v5 = vpop.eup %1057  ;;  %1069 = vtanh.f32 %v292_v3 }
  0xfa   :  { %v1060_v6 = vpop.eup %1059 }
  0xfb   :  { %v1062_v7 = vpop.eup %1061  ;;  %v965_v8 = vpop.f32.mrb[16].mxu0  ;;  %v404_v9 = vpack.c.bf16 %v1060_v6, %v1056_v4 }
  0xfc   :  { %v313_v10 = vadd.f32 %v965_v8, %v1327_v23  ;;  %v304_v11 = vpop.f32.mrb[17].mxu0  ;;  %v403_v12 = vpack.c.bf16 %v1062_v7, %v1058_v5 }
  0xfd   :  { %v305_v13 = vadd.f32 %v1327_v23, %v304_v11  ;;  %v966_v14 = vpop.f32.mrb[18].mxu0  ;;  %v1386_v11 = vld [vmem:[%s1442_s4] ss:$0 sm:$0xff]  ;;  %s1201_s4 = smov [#allocation3]  }
  0xfe   :  { %1071 = vtanh.f32 %v313_v10  ;;  %v316_v15 = vadd.f32 %v966_v14, %v1327_v23  ;;  %v307_v16 = vpop.f32.mrb[19].mxu0  ;;  %991 = vmatprep.mubr.msk.bf16.mxu1 %vm438_vm1, %v403_v12  ;;  %v794_v10 = vld [vmem:[#allocation2] sm:$0x1] }
  0xff   :  { %1073 = vtanh.f32 %v305_v13  ;;  %v308_v17 = vadd.f32 %v1327_v23, %v307_v16  ;;  %992 = vmatmul.mubr.msk.bf16.gmra.mrb[8].mxu1 %vm438_vm1, %v404_v9  ;;  %v745_v9 = vld [vmem:[%s1443_s5 + $0x8] sm:$0xff] }
 0x100   :  { %v1064_v18 = vpop.eup %1063  ;;  %1075 = vtanh.f32 %v316_v15 }
 0x101   :  { %v1066_v19 = vpop.eup %1065  ;;  %1077 = vtanh.f32 %v308_v17 }
 0x102   :  { %v1068_v20 = vpop.eup %1067 }
 0x103   :  { %v1070_v21 = vpop.eup %1069  ;;  %v969_v22 = vpop.f32.mrb[20].mxu0  ;;  %v406_v24 = vpack.c.bf16 %v1068_v20, %v1064_v18 }
 0x104   :  { %v329_v25 = vadd.f32 %v969_v22, %v1327_v23  ;;  %v320_v26 = vpop.f32.mrb[21].mxu0  ;;  %v405_v27 = vpack.c.bf16 %v1070_v21, %v1066_v19 }
 0x105   :  { %v321_v28 = vadd.f32 %v1327_v23, %v320_v26  ;;  %v970_v29 = vpop.f32.mrb[22].mxu0 }
 0x106   :  { %1079 = vtanh.f32 %v329_v25  ;;  %v332_v30 = vadd.f32 %v970_v29, %v1327_v23  ;;  %995 = vmatprep.mubr.msk.bf16.mxu1 %vm438_vm1, %v405_v27  ;;  %v323_v31 = vpop.f32.mrb[23].mxu0 }
 0x107   :  { %1081 = vtanh.f32 %v321_v28  ;;  %v324_v32 = vadd.f32 %v1327_v23, %v323_v31  ;;  %996 = vmatmul.mubr.msk.bf16.gmra.mrb[12].mxu1 %vm438_vm1, %v406_v24 }
 0x108   :  { %v1072_v33 = vpop.eup %1071  ;;  %1083 = vtanh.f32 %v332_v30 }
 0x109   :  { %v1074_v34 = vpop.eup %1073  ;;  %1085 = vtanh.f32 %v324_v32 }
 0x10a   :  { %v1076_v35 = vpop.eup %1075 }
 0x10b   :  { %v1078_v36 = vpop.eup %1077  ;;  %v408_v37 = vpack.c.bf16 %v1076_v35, %v1072_v33  ;;  %v973_v38 = vpop.f32.mrb[24].mxu0 }
 0x10c   :  { %v407_v39 = vpack.c.bf16 %v1078_v36, %v1074_v34  ;;  %v345_v40 = vadd.f32 %v973_v38, %v1327_v23  ;;  %v336_v41 = vpop.f32.mrb[25].mxu0 }
 0x10d   :  { %v337_v42 = vadd.f32 %v1327_v23, %v336_v41  ;;  %v974_v43 = vpop.f32.mrb[26].mxu0 }
 0x10e   :  { %999 = vmatprep.mubr.msk.bf16.mxu1 %vm438_vm1, %v407_v39  ;;  %1087 = vtanh.f32 %v345_v40  ;;  %v348_v44 = vadd.f32 %v974_v43, %v1327_v23  ;;  %v339_v45 = vpop.f32.mrb[27].mxu0 }
 0x10f   :  { %1000 = vmatmul.mubr.msk.bf16.gmra.mrb[16].mxu1 %vm438_vm1, %v408_v37  ;;  %1089 = vtanh.f32 %v337_v42  ;;  %v340_v46 = vadd.f32 %v1327_v23, %v339_v45 }
 0x110   :  { %v1080_v47 = vpop.eup %1079  ;;  %1091 = vtanh.f32 %v348_v44 }
 0x111   :  { %v1082_v48 = vpop.eup %1081  ;;  %1093 = vtanh.f32 %v340_v46 }
 0x112   :  { %v1084_v49 = vpop.eup %1083 }
 0x113   :  { %v1086_v50 = vpop.eup %1085  ;;  %v410_v51 = vpack.c.bf16 %v1084_v49, %v1080_v47  ;;  %v977_v52 = vpop.f32.mrb[28].mxu0 }
 0x114   :  { %v409_v53 = vpack.c.bf16 %v1086_v50, %v1082_v48  ;;  %v361_v54 = vadd.f32 %v977_v52, %v1327_v23  ;;  %v352_v55 = vpop.f32.mrb[29].mxu0 }
 0x115   :  { %v353_v56 = vadd.f32 %v1327_v23, %v352_v55  ;;  %v978_v57 = vpop.f32.mrb[30].mxu0 }
 0x116   :  { %1003 = vmatprep.mubr.msk.bf16.mxu1 %vm438_vm1, %v409_v53  ;;  %1095 = vtanh.f32 %v361_v54  ;;  %v364_v58 = vadd.f32 %v978_v57, %v1327_v23  ;;  %v355_v59 = vpop.f32.mrb[31].mxu0 }
 0x117   :  { %1004 = vmatmul.mubr.msk.bf16.gmra.mrb[20].mxu1 %vm438_vm1, %v410_v51  ;;  %1097 = vtanh.f32 %v353_v56  ;;  %v356_v60 = vadd.f32 %v1327_v23, %v355_v59  ;;  %v744_v23 = vld [vmem:[%s1443_s5] sm:$0xff]  ;;  %s847_s5 = sshll.u32 %s1201_s4, 4  ;;  %s848_s5 = int_to_ptr.vmem [resolvable:$true] %s847_s5 }
 0x118   :  { %v1088_v61 = vpop.eup %1087  ;;  %1099 = vtanh.f32 %v364_v58  ;;  %750 = vperm.xlu0 %1018, %v744_v23   ;;  %s1175_s23 = scalar_lea.vmem %s848_s5, 32  ;;  %p1180_p1 = scmp.lt.s32.totalorder %s848_s5, %s848_s5 }
 0x119   :  { %v1090_v62 = vpop.eup %1089  ;;  %1101 = vtanh.f32 %v356_v60  ;;  %p1176_p0 = scmp.ne.s32.totalorder %s848_s5, %s1175_s23  ;;  %p1181_p2 = scmp.lt.s32.totalorder %s1175_s23, %s1175_s23 }
 0x11a   :  { %v1092_v63 = vpop.eup %1091 }
 0x11b   :  { %v1094_v0 = vpop.eup %1093  ;;  %v412_v1 = vpack.c.bf16 %v1092_v63, %v1088_v61  ;;  %p1182_p3 = por %p1181_p2, %p1180_p1 }
 0x11c   :  { %v411_v2 = vpack.c.bf16 %v1094_v0, %v1090_v62  ;;  %755 = vperm.xlu0 %1018, %v745_v9  }
 0x11d   :  { %p1183_p4 = pnand %p1182_p3, %p1176_p0 }
 0x11e   :  { %1007 = vmatprep.mubr.msk.bf16.mxu1 %vm438_vm1, %v411_v2 }
 0x11f   :  { %1008 = vmatmul.mubr.msk.bf16.gmra.mrb[24].mxu1 %vm438_vm1, %v412_v1 }
 0x120   :  { %v1096_v3 = vpop.eup %1095  ;;  %797 = vperm.xlu0 %1018, %v794_v10  }
 0x121   :  { %v1098_v4 = vpop.eup %1097 }
 0x122   :  { %v1100_v5 = vpop.eup %1099 }
 0x123   :  { %v1102_v6 = vpop.eup %1101  ;;  %v414_v7 = vpack.c.bf16 %v1100_v5, %v1096_v3 }
 0x124   :  { %v413_v8 = vpack.c.bf16 %v1102_v6, %v1098_v4 }
 0x126   :  { %1011 = vmatprep.mubr.msk.bf16.mxu1 %vm438_vm1, %v413_v8 }
 0x127   :  { %1012 = vmatmul.mubr.msk.bf16.gmra.mrb[28].mxu1 %vm438_vm1, %v414_v7 }
 0x1c2   :  { %v985_v12 = vpop.f32.mrb[0].mxu1 }
 0x1c3   :  { %v521_v13 = vpop.f32.mrb[1].mxu1  ;;  %v530_v18 = vadd.f32 %v985_v12, %v1386_v11 }
 0x1c4   :  { %v522_v14 = vadd.f32 %v1386_v11, %v521_v13  ;;  %v986_v15 = vpop.f32.mrb[2].mxu1 }
 0x1c5   :  { %v524_v16 = vpop.f32.mrb[3].mxu1  ;;  %v533_v24 = vadd.f32 %v986_v15, %v1386_v11 }
 0x1c6   :  { %1103 = vtanh.f32 %v522_v14  ;;  %v525_v17 = vadd.f32 %v1386_v11, %v524_v16 }
 0x1c8   :  { %1105 = vtanh.f32 %v525_v17 }
 0x1c9   :  { %1107 = vtanh.f32 %v530_v18 }
 0x1ca   :  { %v989_v19 = vpop.f32.mrb[4].mxu1  ;;  %1109 = vtanh.f32 %v533_v24 }
 0x1cb   :  { %v537_v20 = vpop.f32.mrb[5].mxu1  ;;  %v546_v34 = vadd.f32 %v989_v19, %v1386_v11 }
 0x1cc   :  { %v990_v21 = vpop.f32.mrb[6].mxu1  ;;  %v538_v26 = vadd.f32 %v1386_v11, %v537_v20 }
 0x1cd   :  { %v540_v22 = vpop.f32.mrb[7].mxu1  ;;  %v549_v40 = vadd.f32 %v990_v21, %v1386_v11 }
 0x1ce   :  { %1111 = vtanh.f32 %v538_v26  ;;  %v541_v32 = vadd.f32 %v1386_v11, %v540_v22 }
 0x1d0   :  { %v1104_v25 = vpop.eup %1103  ;;  %1113 = vtanh.f32 %v541_v32 }
 0x1d1   :  { %680 = vxpose.xlu1.b32.start [1/16] (narrow) %v1104_v25, 32  ;;  %1115 = vtanh.f32 %v546_v34 }
 0x1d2   :  { %v993_v27 = vpop.f32.mrb[8].mxu1  ;;  %v1106_v29 = vpop.eup %1105  ;;  %1117 = vtanh.f32 %v549_v40 }
 0x1d3   :  { %v553_v28 = vpop.f32.mrb[9].mxu1  ;;  %v1108_v33 = vpop.eup %1107  ;;  %v562_v52 = vadd.f32 %v993_v27, %v1386_v11 }
 0x1d4   :  { %v994_v30 = vpop.f32.mrb[10].mxu1  ;;  %v1110_v37 = vpop.eup %1109  ;;  %v554_v42 = vadd.f32 %v1386_v11, %v553_v28 }
 0x1d5   :  { %v556_v31 = vpop.f32.mrb[11].mxu1  ;;  %681 = vxpose.xlu1.b32.cont [2/16] (narrow) %v1106_v29, 32  ;;  %v565_v58 = vadd.f32 %v994_v30, %v1386_v11 }
 0x1d6   :  { %1119 = vtanh.f32 %v554_v42  ;;  %v557_v48 = vadd.f32 %v1386_v11, %v556_v31 }
 0x1d8   :  { %v1112_v41 = vpop.eup %1111 }
 0x1d9   :  { %682 = vxpose.xlu1.b32.cont [3/16] (narrow) %v1108_v33, 32 }
 0x1da   :  { %v1395_v35 = vpop.f32.mrb[12].mxu1  ;;  %v1114_v45 = vpop.eup %1113 }
 0x1db   :  { %v569_v36 = vpop.f32.mrb[13].mxu1  ;;  %v1116_v51 = vpop.eup %1115  ;;  %v578_v15 = vadd.f32 %v1395_v35, %v1386_v11 }
 0x1dc   :  { %v1397_v38 = vpop.f32.mrb[14].mxu1  ;;  %v1118_v56 = vpop.eup %1117  ;;  %v570_v63 = vadd.f32 %v1386_v11, %v569_v36 }
 0x1dd   :  { %v572_v39 = vpop.f32.mrb[15].mxu1  ;;  %683 = vxpose.xlu1.b32.cont [4/16] (narrow) %v1110_v37, 32  ;;  %v581_v25 = vadd.f32 %v1397_v38, %v1386_v11 }
 0x1de   :  { %v573_v8 = vadd.f32 %v1386_v11, %v572_v39 }
 0x1e0   :  { %v1120_v61 = vpop.eup %1119 }
 0x1e1   :  { %684 = vxpose.xlu1.b32.cont [5/16] (narrow) %v1112_v41, 32 }
 0x1e2   :  { %v1001_v43 = vpop.f32.mrb[16].mxu1 }
 0x1e3   :  { %v585_v44 = vpop.f32.mrb[17].mxu1  ;;  %v594_v53 = vadd.f32 %v1001_v43, %v1386_v11 }
 0x1e4   :  { %v586_v46 = vadd.f32 %v1386_v11, %v585_v44  ;;  %v1002_v47 = vpop.f32.mrb[18].mxu1 }
 0x1e5   :  { %v588_v49 = vpop.f32.mrb[19].mxu1  ;;  %685 = vxpose.xlu1.b32.cont [6/16] (narrow) %v1114_v45, 32  ;;  %v597_v60 = vadd.f32 %v1002_v47, %v1386_v11  ;;  %v761_v45 = vpop.permute.xlu1 %760 }
 0x1e6   :  { %1121 = vtanh.f32 %v586_v46  ;;  %v589_v50 = vadd.f32 %v1386_v11, %v588_v49  ;;  %v751_v49 = vpop.permute.xlu0 %750 }
 0x1e7   :  { %1123 = vtanh.f32 %v557_v48 }
 0x1e8   :  { %1125 = vtanh.f32 %v589_v50 }
 0x1e9   :  { %686 = vxpose.xlu1.b32.cont [7/16] (narrow) %v1116_v51, 32  ;;  %1127 = vtanh.f32 %v562_v52  ;;  %v766_v46 = vpop.permute.xlu1 %765 }
 0x1ea   :  { %v1005_v54 = vpop.f32.mrb[20].mxu1  ;;  %1129 = vtanh.f32 %v594_v53  ;;  %v756_v51 = vpop.permute.xlu0 %755 }
 0x1eb   :  { %v601_v55 = vpop.f32.mrb[21].mxu1  ;;  %1131 = vtanh.f32 %v565_v58  ;;  %v610_v16 = vadd.f32 %v1005_v54, %v1386_v11 }
 0x1ec   :  { %v1006_v57 = vpop.f32.mrb[22].mxu1  ;;  %1133 = vtanh.f32 %v597_v60  ;;  %v602_v0 = vadd.f32 %v1386_v11, %v601_v55 }
 0x1ed   :  { %687 = vxpose.xlu1.b32.cont [8/16] (narrow) %v1118_v56, 32  ;;  %v604_v59 = vpop.f32.mrb[23].mxu1  ;;  %1135 = vtanh.f32 %v570_v63  ;;  %v613_v28 = vadd.f32 %v1006_v57, %v1386_v11 }
 0x1ee   :  { %1137 = vtanh.f32 %v602_v0  ;;  %v605_v10 = vadd.f32 %v1386_v11, %v604_v59  ;;  %v798_v60 = vpop.permute.xlu0 %797 }
 0x1ef   :  { %1139 = vtanh.f32 %v573_v8 }
 0x1f0   :  { %v1122_v62 = vpop.eup %1121  ;;  %1141 = vtanh.f32 %v605_v10 }
 0x1f1   :  { %712 = vxpose.xlu0.b32.start [1/16] (narrow) %v1122_v62, 32  ;;  %688 = vxpose.xlu1.b32.cont [9/16] (narrow) %v1120_v61, 32  ;;  %v1124_v2 = vpop.eup %1123  ;;  %1143 = vtanh.f32 %v578_v15 }
 0x1f2   :  { %v1009_v1 = vpop.f32.mrb[24].mxu1  ;;  %v1126_v5 = vpop.eup %1125  ;;  %1145 = vtanh.f32 %v610_v16 }
 0x1f3   :  { %v626_v3 = vadd.f32 %v1009_v1, %v1386_v11  ;;  %v617_v4 = vpop.f32.mrb[25].mxu1  ;;  %v1128_v13 = vpop.eup %1127  ;;  %1147 = vtanh.f32 %v581_v25 }
 0x1f4   :  { %v618_v6 = vadd.f32 %v1386_v11, %v617_v4  ;;  %v1010_v7 = vpop.f32.mrb[26].mxu1  ;;  %v1130_v14 = vpop.eup %1129  ;;  %1149 = vtanh.f32 %v613_v28 }
 0x1f5   :  { %713 = vxpose.xlu0.b32.cont [2/16] (narrow) %v1126_v5, 32  ;;  %689 = vxpose.xlu1.b32.cont [10/16] (narrow) %v1124_v2, 32  ;;  %v629_v23 = vadd.f32 %v1010_v7, %v1386_v11  ;;  %v620_v9 = vpop.f32.mrb[27].mxu1  ;;  %v1132_v18 = vpop.eup %1131  ;;  %v800_v2 = vlaneseq }
 0x1f6   :  { %v621_v12 = vadd.f32 %v1386_v11, %v620_v9  ;;  %v1134_v21 = vpop.eup %1133  ;;  %1151 = vtanh.f32 %v618_v6 }
 0x1f7   :  { %v1136_v30 = vpop.eup %1135  ;;  %v801_v8 = vshrl.u32 %v800_v2, 7  ;;  %vm838_vm2 = vcmp.lt.s32.totalorder %v800_v2, 256 }
 0x1f8   :  { %v1138_v31 = vpop.eup %1137  ;;  %1153 = vtanh.f32 %v621_v12 }
 0x1f9   :  { %714 = vxpose.xlu0.b32.cont [3/16] (narrow) %v1130_v14, 32  ;;  %690 = vxpose.xlu1.b32.cont [11/16] (narrow) %v1128_v13, 32  ;;  %v1140_v32 = vpop.eup %1139  ;;  %1155 = vtanh.f32 %v626_v3  ;;  %v802_v14 = vsub.s32 0, %v801_v8 }
 0x1fa   :  { %v1013_v17 = vpop.f32.mrb[28].mxu1  ;;  %v1142_v33 = vpop.eup %1141  ;;  %1157 = vtanh.f32 %v629_v23 }
 0x1fb   :  { %v642_v19 = vadd.f32 %v1013_v17, %v1386_v11  ;;  %v633_v20 = vpop.f32.mrb[29].mxu1  ;;  %v1144_v34 = vpop.eup %1143 }
 0x1fc   :  { %v634_v22 = vadd.f32 %v1386_v11, %v633_v20  ;;  %v1014_v24 = vpop.f32.mrb[30].mxu1  ;;  %v1146_v35 = vpop.eup %1145 }
 0x1fd   :  { %715 = vxpose.xlu0.b32.cont [4/16] (narrow) %v1134_v21, 32  ;;  %691 = vxpose.xlu1.b32.cont [12/16] (narrow) %v1132_v18, 32  ;;  %v645_v26 = vadd.f32 %v1014_v24, %v1386_v11  ;;  %v636_v27 = vpop.f32.mrb[31].mxu1  ;;  %v1148_v36 = vpop.eup %1147  ;;  %v803_v18 = vrot.slane %v798_v60, %v802_v14 }
 0x1fe   :  { %v637_v29 = vadd.f32 %v1386_v11, %v636_v27  ;;  %v1150_v37 = vpop.eup %1149  ;;  %1159 = vtanh.f32 %v634_v22 }
 0x200   :  { %v1152_v11 = vpop.eup %1151  ;;  %1161 = vtanh.f32 %v637_v29 }
 0x201   :  { %716 = vxpose.xlu0.b32.cont [5/16] (narrow) %v1138_v31, 32  ;;  %692 = vxpose.xlu1.b32.cont [13/16] (narrow) %v1136_v30, 32  ;;  %1163 = vtanh.f32 %v642_v19 }
 0x202   :  { %v1154_v38 = vpop.eup %1153  ;;  %1165 = vtanh.f32 %v645_v26 }
 0x203   :  { %v1156_v39 = vpop.eup %1155 }
 0x204   :  { %v1158_v40 = vpop.eup %1157 }
 0x205   :  { %717 = vxpose.xlu0.b32.cont [6/16] (narrow) %v1142_v33, 32  ;;  %693 = vxpose.xlu1.b32.cont [14/16] (narrow) %v1140_v32, 32  ;;  %v1200_v33 = vmov 1966171168  }
 0x208   :  { %v1160_v41 = vpop.eup %1159 }
 0x209   :  { %718 = vxpose.xlu0.b32.cont [7/16] (narrow) %v1146_v35, 32  ;;  %694 = vxpose.xlu1.b32.cont [15/16] (narrow) %v1144_v34, 32  ;;  %v822_v34 = vunpack.c.l.s4 %v1200_v33 }
 0x20a   :  { %v1162_v42 = vpop.eup %1161 }
 0x20b   :  { %v1164_v43 = vpop.eup %1163  ;;  %v823_v35 = vunpack.c.0.s8 %v822_v34 }
 0x20c   :  { %v1166_v44 = vpop.eup %1165 }
 0x20d   :  { %719 = vxpose.xlu0.b32.cont [8/16] (narrow) %v1150_v37, 32  ;;  %695 = vxpose.xlu1.b32.end [16/16] (narrow) %v1148_v36, 32  ;;  %v826_v37 = vsub.s32 %v823_v35, %v801_v8 }
 0x211   :  { %720 = vxpose.xlu0.b32.cont [9/16] (narrow) %v1152_v11, 32 }
 0x215   :  { %721 = vxpose.xlu0.b32.cont [10/16] (narrow) %v1154_v38, 32 }
 0x219   :  { %722 = vxpose.xlu0.b32.cont [11/16] (narrow) %v1156_v39, 32 }
 0x21d   :  { %723 = vxpose.xlu0.b32.cont [12/16] (narrow) %v1158_v40, 32 }
 0x221   :  { %724 = vxpose.xlu0.b32.cont [13/16] (narrow) %v1160_v41, 32 }
 0x225   :  { %725 = vxpose.xlu0.b32.cont [14/16] (narrow) %v1162_v42, 32 }
 0x229   :  { %726 = vxpose.xlu0.b32.cont [15/16] (narrow) %v1164_v43, 32 }
 0x22d   :  { %727 = vxpose.xlu0.b32.end [16/16] (narrow) %v1166_v44, 32 }
 0x251   :  { %v696_v47 = vpop.trf.xlu1 }
 0x252   :  { %v768_v54 = vmul.f32 %v751_v49, %v696_v47 }
 0x255   :  { %v697_v48 = vpop.trf.xlu1 }
 0x256   :  { %v770_v52 = vmul.f32 %v756_v51, %v697_v48 }
 0x258   :  { %v776_v56 = vadd.f32 %v770_v52, %v768_v54 }
 0x259   :  { %v698_v50 = vpop.trf.xlu1 }
 0x25a   :  { %v772_v55 = vmul.f32 %v761_v45, %v698_v50 }
 0x25c   :  { %v777_v58 = vadd.f32 %v776_v56, %v772_v55 }
 0x25d   :  { %v699_v53 = vpop.trf.xlu1 }
 0x25e   :  { %v774_v57 = vmul.f32 %v766_v46, %v699_v53 }
 0x260   :  { %v778_v59 = vadd.f32 %v777_v58, %v774_v57 }
 0x262   :  { %v779_v61 = vrot.slane %v778_v59, 4 }
 0x264   :  { %v780_v62 = vadd.f32 %v779_v61, %v778_v59 }
 0x266   :  { %v781_v0 = vrot.slane %v780_v62, 2 }
 0x268   :  { %v782_v4 = vadd.f32 %v781_v0, %v780_v62 }
 0x26a   :  { %v783_v9 = vrot.slane %v782_v4, 1 }
 0x26c   :  { %v784_v16 = vadd.f32 %v783_v9, %v782_v4 }
 0x26e   :  { %v804_v20 = vadd.f32 %v803_v18, %v784_v16 }
 0x270   :  { %v908_v24 = vmul.f32 -1.442695, %v804_v20 }
 0x271   :  { %v728_v63 = vpop.trf.xlu0 }
 0x272   :  { %v769_v6 = vmul.f32 %v751_v49, %v728_v63  ;;  %1167 = vpow2.f32 %v908_v24 }
 0x275   :  { %v729_v1 = vpop.trf.xlu0 }
 0x276   :  { %v771_v3 = vmul.f32 %v756_v51, %v729_v1 }
 0x278   :  { %v785_v23 = vadd.f32 %v771_v3, %v769_v6 }
 0x279   :  { %v730_v5 = vpop.trf.xlu0 }
 0x27a   :  { %v773_v7 = vmul.f32 %v761_v45, %v730_v5 }
 0x27c   :  { %v786_v12 = vadd.f32 %v785_v23, %v773_v7  ;;  %v1168_v29 = vpop.eup %1167 }
 0x27d   :  { %v731_v10 = vpop.trf.xlu0  ;;  %v812_v30 = vadd.f32 1.0, %v1168_v29 }
 0x27e   :  { %v775_v13 = vmul.f32 %v766_v46, %v731_v10 }
 0x280   :  { %v787_v15 = vadd.f32 %v786_v12, %v775_v13 }
 0x282   :  { %v788_v17 = vrot.slane %v787_v15, 4 }
 0x284   :  { %v789_v19 = vadd.f32 %v788_v17, %v787_v15 }
 0x286   :  { %v790_v21 = vrot.slane %v789_v19, 2 }
 0x288   :  { %v791_v22 = vadd.f32 %v790_v21, %v789_v19 }
 0x28a   :  { %v792_v25 = vrot.slane %v791_v22, 1 }
 0x28c   :  { %v793_v26 = vadd.f32 %v792_v25, %v791_v22 }
 0x28e   :  { %v805_v27 = vadd.f32 %v803_v18, %v793_v26 }
 0x290   :  { %v909_v28 = vmul.f32 -1.442695, %v805_v27 }
 0x292   :  { %1169 = vpow2.f32 %v909_v28 }
 0x293   :  { %1171 = vrcp.f32 %v812_v30 }
 0x29c   :  { %v1170_v31 = vpop.eup %1169 }
 0x29d   :  { %v813_v32 = vadd.f32 1.0, %v1170_v31  ;;  %v1172_v36 = vpop.eup %1171 }
 0x29f   :  { %1173 = vrcp.f32 %v813_v32 }
 0x2a9   :  { %v1174_v11 = vpop.eup %1173 }
 0x2aa   :  { %v820_v38 = vcombine.low %v1172_v36, %v1174_v11 }
 0x2ac   :  { %v827_v39 = vrot.slane %v820_v38, %v826_v37 }
 0x2ae   :  { %v834_v40 = vrot.slane %v827_v39, %v826_v37 }
 0x2b0   :  { %840 = vst.msk [vmem:[#allocation3] sm:$0x3] %vm838_vm2, %v834_v40 }
 0x2b1   :  { %1186 = shalt.err (!%p1183_p4)
}
 0x2b2   :  { %s1187_s26 = scalar_lea.hbm %s1445_s7, 32 }
 0x2b3   :  { %p1188_p5 = scmp.ne.s32.totalorder %s1445_s7, %s1187_s26  ;;  %p1191_p6 = scmp.lt.u32.totalorder %s1187_s26, %s1445_s7 }
 0x2b5   :  { %p1193_p7 = pnand %p1191_p6, %p1188_p5 }
 0x2b7   :  { %1196 = shalt.err (!%p1193_p7)
}
 0x2b8   :  { %850 = dma.vmem_to_hbm [thread:$0]  %s848_s5, 32, %s1445_s7, [#allocation4]  }
 0x2b9   :  { %1197 = dma.done.wait [#allocation4], 32  }
 0x2ba   :  { %1198 = vsyncadd [#allocation4], 4294967264 }
 0x2bb   :  { %854 = vsyncpa [#allocation4], 1 }

</bundles_post_ra>
